<compile_context>
chip_gen: v6e
topology: v6e:2x2x1
jax: 0.10.0
libtpu: 0.0.40
codegen_flags: <defaults>
</compile_context>

<pallas_src>
import math

import jax
import jax.numpy as jnp
from jax import lax
from jax.experimental import pallas as pl
from jax.experimental.pallas import tpu as pltpu


def _round_up(x, m):
    return ((x + m - 1) // m) * m


def _cdiv(a, b):
    return -(-a // b)


# --------------------------------------------------------------------------
# Kernel body
# --------------------------------------------------------------------------
def _mlp_caps_kernel(x_ref, w_ref, b_ref, s_ref, st_ref, o_ref):
    """Lane-dense capsule MLP on one row tile.

    x_ref : (tn, d_p)   folded (and column-padded) rows
    w_ref : (d_p, d_p)  block-diagonal capsule weights (replicated per fold)
    b_ref : (1, d_p)    flattened (replicated) biases
    s_ref : (d_p, kf)   capsule-column indicator (1 where column is in capsule)
    st_ref: (kf, d_p)   its transpose (broadcast matrix)
    o_ref : (tn, d_p)
    """
    x = x_ref[...]

    # Big block-diagonal matmul depends only on x -> can be pushed to the MXU
    # immediately and overlap the normalization chain below.
    xw = jnp.dot(x, w_ref[...], preferred_element_type=jnp.float32)          # (tn, d_p)

    # Per-capsule sum of squares via one MXU matmul (no (tn, k, dd) reshape).
    sumsq = jnp.dot(x * x, s_ref[...], preferred_element_type=jnp.float32)   # (tn, kf)
    # F.normalize(dim=2, eps=1e-12): x / max(||x||, eps) == x * rsqrt(max(sumsq, eps^2))
    inv = lax.rsqrt(jnp.maximum(sumsq, 1e-24))                               # EUP slot
    scale = jnp.dot(inv, st_ref[...], preferred_element_type=jnp.float32)    # (tn, d_p)

    # scale is constant within each capsule block and W is block-diagonal per
    # capsule, so (x * scale) @ W == (x @ W) * scale exactly.
    o_ref[...] = (xw * scale + b_ref[...]).astype(o_ref.dtype)


# --------------------------------------------------------------------------
# Parameter packing (hoist out of the per-call path when weights are reused)
# --------------------------------------------------------------------------
def pack_mlp_params(weights, biases):
    """weights: (k, delta_d, delta_d); biases: (k, delta_d).

    Returns the lane-dense operands consumed by the kernel.
    """
    k, dd, dd2 = weights.shape
    assert dd == dd2
    d = k * dd

    # Fold several rows into the 128-lane axis when d divides 128; otherwise
    # fold=1 and columns are padded up to a multiple of 128 (dummy capsule).
    fold = (128 // d) if (d <= 128 and 128 % d == 0) else 1
    d_f = d * fold
    d_p = _round_up(d_f, 128)
    kf = k * fold
    has_dummy = d_p > d_f
    kf_total = kf + (1 if has_dummy else 0)

    wdt = jnp.float32
    w = weights.astype(wdt)
    # Block-diagonal weight (d, d): capsule blocks W_i on the diagonal.
    eye_k = jnp.eye(k, dtype=wdt)
    w_d = jnp.einsum("iab,ij->iajb", w, eye_k).reshape(d, d)
    # Replicate `fold` times along the diagonal -> (d_f, d_f), pad to (d_p, d_p).
    w_bd = jnp.kron(jnp.eye(fold, dtype=wdt), w_d)
    if has_dummy:
        w_bd = jnp.pad(w_bd, ((0, d_p - d_f), (0, d_p - d_f)))
    # TODO(synk): for very large d (resident W_bd = 4*d^2 bytes) add a K-tiling
    # grid axis over capsule groups instead of keeping the full W resident.

    b_flat = jnp.tile(biases.astype(wdt).reshape(-1), fold)
    if has_dummy:
        b_flat = jnp.pad(b_flat, (0, d_p - d_f))
    b_flat = b_flat.reshape(1, d_p)

    # Static 0/1 capsule-column indicator and its transpose.  Padded columns
    # map to a dummy capsule (zero weights/bias, sliced off afterwards).
    cols = jnp.arange(d_p, dtype=jnp.int32)
    caps = jnp.where(cols < d_f, (cols // d) * k + (cols % d) // dd, kf)
    s_mat = (caps[:, None] == jnp.arange(kf_total, dtype=jnp.int32)[None, :]
             ).astype(jnp.float32)                                   # (d_p, kf_total)
    st_mat = s_mat.T                                                 # (kf_total, d_p)

    return dict(w_bd=w_bd, b_flat=b_flat, s_mat=s_mat, st_mat=st_mat,
                fold=fold, d=d, d_f=d_f, d_p=d_p, kf_total=kf_total)


# --------------------------------------------------------------------------
# Row-tile selection (adaptive padding, per-chip VMEM budget, v7x dual-TC)
# --------------------------------------------------------------------------
def _choose_row_tiling(n_f, d_p, kf_total, itemsize, tn_target):
    try:
        info = pltpu.get_tpu_info()
        vmem_cap = int(getattr(info, "vmem_capacity_bytes", 0)) or 64 * 1024 * 1024
    except Exception:  # non-TPU trace / older runtime
        vmem_cap = 64 * 1024 * 1024
    vmem_budget = vmem_cap // 2          # ~50% of physical: 32 MiB v7x, 64 MiB v5e/v6e

    # Resident operands (weights, bias, indicators) + per-row pipeline cost:
    # 2x double-buffered input tile + 2x output tile + ~4 f32 intermediates.
    resident = 4 * (d_p * d_p + d_p + 2 * d_p * kf_total)
    avail = max(vmem_budget - resident, 2 * 1024 * 1024)
    per_row = (4 * itemsize + 4 * 4) * d_p
    tn_cap = max(8, (avail // per_row) // 8 * 8)

    target = max(8, min(tn_target, tn_cap))
    num_tiles = _cdiv(max(n_f, 1), target)
    # Keep both v7x TensorCores busy once there is enough work to split.
    if n_f > 512 and num_tiles < 2:
        num_tiles = 2
    tn = _round_up(_cdiv(max(n_f, 1), num_tiles), 8)
    n_f_pad = num_tiles * tn
    return tn, n_f_pad, vmem_budget


# --------------------------------------------------------------------------
# Forward wrapper
# --------------------------------------------------------------------------
def mlp_layer_forward(x, weights, biases, neighbors=None, max_iter=None, *,
                      packed=None, tn_target=4096):
    """x: (n, d) f32; weights: (k, delta_d, delta_d); biases: (k, delta_d).

    `neighbors` / `max_iter` are accepted for parity with the PyTorch forward
    signature but (as in the reference code) do not influence the output.
    Pass `packed=pack_mlp_params(weights, biases)` to hoist parameter packing
    out of repeated calls.
    """
    n, d = x.shape
    if packed is None:
        packed = pack_mlp_params(weights, biases)
    assert packed["d"] == d

    fold = packed["fold"]
    d_f = packed["d_f"]
    d_p = packed["d_p"]
    kf_total = packed["kf_total"]

    # Row tiling (folded rows). Pad with zero rows; padding is sliced off.
    n_f = _cdiv(n, fold)
    tn, n_f_pad, vmem_limit = _choose_row_tiling(
        n_f, d_p, kf_total, jnp.dtype(x.dtype).itemsize, tn_target)
    n_pad = n_f_pad * fold

    x_p = x if n_pad == n else jnp.pad(x, ((0, n_pad - n), (0, 0)))
    x_folded = x_p.reshape(n_f_pad, d_f)
    if d_p > d_f:
        x_folded = jnp.pad(x_folded, ((0, 0), (0, d_p - d_f)))

    grid = (n_f_pad // tn,)
    flops = 2 * n_f_pad * d_p * (d_p + 2 * kf_total) + 3 * n_f_pad * d_p
    bytes_accessed = (jnp.dtype(x.dtype).itemsize * 2 * n_f_pad * d_p
                      + 4 * (d_p * d_p + d_p + 2 * d_p * kf_total))

    out_folded = pl.pallas_call(
        _mlp_caps_kernel,
        out_shape=jax.ShapeDtypeStruct((n_f_pad, d_p), x.dtype),
        grid=grid,
        in_specs=[
            pl.BlockSpec((tn, d_p), lambda i: (i, 0)),          # x tile (pipelined)
            pl.BlockSpec((d_p, d_p), lambda i: (0, 0)),         # W_blockdiag (resident)
            pl.BlockSpec((1, d_p), lambda i: (0, 0)),           # bias (resident)
            pl.BlockSpec((d_p, kf_total), lambda i: (0, 0)),    # S (resident)
            pl.BlockSpec((kf_total, d_p), lambda i: (0, 0)),    # S.T (resident)
        ],
        out_specs=pl.BlockSpec((tn, d_p), lambda i: (i, 0)),
        compiler_params=pltpu.CompilerParams(
            dimension_semantics=("parallel",),
            vmem_limit_bytes=int(vmem_limit),
        ),
        cost_estimate=pl.CostEstimate(
            flops=flops,
            transcendentals=n_f_pad * kf_total,
            bytes_accessed=bytes_accessed,
        ),
    )(x_folded, packed["w_bd"], packed["b_flat"], packed["s_mat"], packed["st_mat"])

    if d_p > d_f:
        out_folded = out_folded[:, :d_f]
    return out_folded.reshape(n_pad, d)[:n]


# --------------------------------------------------------------------------
# Pure-JAX reference
# --------------------------------------------------------------------------
def _reference(x, weights, biases):
    n, d = x.shape
    k, dd, _ = weights.shape
    xk = x.reshape(n, k, dd)
    norm = jnp.sqrt(jnp.sum(xk * xk, axis=-1, keepdims=True))
    xk = xk / jnp.maximum(norm, 1e-12)
    u = jnp.einsum("nkd,kde->nke", xk, weights) + biases[None, :, :]
    return u.reshape(n, d)


if __name__ == "__main__":
    # Shapes consistent with the module: dim=32, num_caps=4 -> delta_d=8.
    dim, num_caps = 32, 4
    delta_d = dim // num_caps
    n, m = 8, 2  # n nodes, m neighbors per node

    key = jax.random.PRNGKey(0)
    kx, kw, kb, kn = jax.random.split(key, 4)

    x = jax.random.normal(kx, (n, dim), dtype=jnp.float32)

    # Deterministic parameter init mirroring Linear.reset_parameters shapes:
    #   weight (delta_d, delta_d) ~ kaiming_uniform(fan_out, a=sqrt(5))
    #   bias   (delta_d,)         ~ U(-1/sqrt(delta_d), 1/sqrt(delta_d))
    gain = math.sqrt(2.0 / (1.0 + 5.0))          # a = sqrt(5)
    bound_w = gain * math.sqrt(3.0 / delta_d)    # fan_out = delta_d
    weights = jax.random.uniform(
        kw, (num_caps, delta_d, delta_d), dtype=jnp.float32,
        minval=-bound_w, maxval=bound_w)
    stdv = 1.0 / math.sqrt(delta_d)
    biases = jax.random.uniform(
        kb, (num_caps, delta_d), dtype=jnp.float32, minval=-stdv, maxval=stdv)

    # neighbors tensor (unused by the math, kept for signature parity)
    neighbors = jax.random.randint(kn, (n * m,), 0, n, dtype=jnp.int32)
    max_iter = 3

    # Hoist parameter packing out of the per-call path (reused below).
    packed = pack_mlp_params(weights, biases)

    out = jax.block_until_ready(
        mlp_layer_forward(x, weights, biases, neighbors, max_iter, packed=packed))
    ref = _reference(x, weights, biases)
    assert out.shape == (n, dim)
    assert jnp.allclose(out, ref, atol=1e-5, rtol=1e-5), "mismatch vs reference"

    # Row count not a multiple of the lane-fold (padding path) + all-zero row
    # (eps clamp path).
    x2 = jax.random.normal(jax.random.PRNGKey(1), (10, dim), dtype=jnp.float32)
    x2 = x2.at[3].set(0.0)
    out2 = jax.block_until_ready(mlp_layer_forward(x2, weights, biases, packed=packed))
    assert out2.shape == (10, dim)
    assert jnp.allclose(out2, _reference(x2, weights, biases),
                        atol=1e-5, rtol=1e-5), "mismatch (padded case)"

    # Multi-tile grid path: n_f > 512 forces >= 2 grid steps (v7x dual-TC).
    x3 = jax.random.normal(jax.random.PRNGKey(2), (4100, dim), dtype=jnp.float32)
    out3 = jax.block_until_ready(mlp_layer_forward(x3, weights, biases, packed=packed))
    assert out3.shape == (4100, dim)
    assert jnp.allclose(out3, _reference(x3, weights, biases),
                        atol=1e-5, rtol=1e-5), "mismatch (multi-tile case)"

    # Hardened fallback: d does not divide 128 (fold=1, columns padded to 128).
    dim_b, caps_b = 48, 3
    dd_b = dim_b // caps_b
    wb = jax.random.uniform(jax.random.PRNGKey(3), (caps_b, dd_b, dd_b),
                            dtype=jnp.float32, minval=-0.3, maxval=0.3)
    bb = jax.random.uniform(jax.random.PRNGKey(4), (caps_b, dd_b),
                            dtype=jnp.float32, minval=-0.2, maxval=0.2)
    xb = jax.random.normal(jax.random.PRNGKey(5), (9, dim_b), dtype=jnp.float32)
    outb = jax.block_until_ready(mlp_layer_forward(xb, wb, bb))
    assert outb.shape == (9, dim_b)
    assert jnp.allclose(outb, _reference(xb, wb, bb),
                        atol=1e-5, rtol=1e-5), "mismatch (fallback d case)"

    print("KERNEL_OK")
</pallas_src>

<mosaic_0001>
module attributes {stable_mosaic.version = 11 : i64} {
  func.func @_mlp_caps_kernel(%arg0: i32, %arg1: memref<8x128xf32, #tpu.memory_space<vmem>>, %arg2: memref<128x128xf32, #tpu.memory_space<vmem>>, %arg3: memref<1x128xf32, #tpu.memory_space<vmem>>, %arg4: memref<128x16xf32, #tpu.memory_space<vmem>>, %arg5: memref<16x128xf32, #tpu.memory_space<vmem>>, %arg6: memref<8x128xf32, #tpu.memory_space<vmem>>) attributes {dimension_semantics = [#tpu.dimension_semantics<parallel>], iteration_bounds = array<i64: 1>, scalar_prefetch = 0 : i64, scratch_operands = 0 : i64, tpu.core_type = #tpu.core_type<tc>, window_params = [{transform_indices = @transform_0, window_bounds = array<i64: 8, 128>}, {pipeline_mode = #tpu.pipeline_mode<synchronous>, transform_indices = @transform_1, window_bounds = array<i64: 128, 128>}, {pipeline_mode = #tpu.pipeline_mode<synchronous>, transform_indices = @transform_2, window_bounds = array<i64: 1, 128>}, {pipeline_mode = #tpu.pipeline_mode<synchronous>, transform_indices = @transform_3, window_bounds = array<i64: 128, 16>}, {pipeline_mode = #tpu.pipeline_mode<synchronous>, transform_indices = @transform_4, window_bounds = array<i64: 16, 128>}, {transform_indices = @transform_5, window_bounds = array<i64: 8, 128>}]} {
    %c0 = arith.constant 0 : index
    %c0_0 = arith.constant 0 : index
    %0 = vector.load %arg1[%c0, %c0_0] : memref<8x128xf32, #tpu.memory_space<vmem>>, vector<8x128xf32>
    %c0_1 = arith.constant 0 : index
    %c0_2 = arith.constant 0 : index
    %1 = vector.load %arg2[%c0_1, %c0_2] : memref<128x128xf32, #tpu.memory_space<vmem>>, vector<128x128xf32>
    %cst = arith.constant dense<0.000000e+00> : vector<8x128xf32>
    %2 = tpu.matmul %0, %1, %cst {dimension_numbers = #tpu.dot_dimension_numbers<[1], [0], [0], [1], [0, 0, 1, 1], [], []>} : vector<8x128xf32>, vector<128x128xf32>, vector<8x128xf32> -> vector<8x128xf32>
    %3 = arith.mulf %0, %0 : vector<8x128xf32>
    %c0_3 = arith.constant 0 : index
    %c0_4 = arith.constant 0 : index
    %4 = vector.load %arg4[%c0_3, %c0_4] : memref<128x16xf32, #tpu.memory_space<vmem>>, vector<128x16xf32>
    %cst_5 = arith.constant dense<0.000000e+00> : vector<8x16xf32>
    %5 = tpu.matmul %3, %4, %cst_5 {dimension_numbers = #tpu.dot_dimension_numbers<[1], [0], [0], [1], [0, 0, 1, 1], [], []>} : vector<8x128xf32>, vector<128x16xf32>, vector<8x16xf32> -> vector<8x16xf32>
    %cst_6 = arith.constant 1.000000e-24 : f32
    %6 = vector.broadcast %cst_6 : f32 to vector<8x16xf32>
    %7 = arith.maximumf %5, %6 : vector<8x16xf32>
    %8 = math.rsqrt %7 : vector<8x16xf32>
    %c0_7 = arith.constant 0 : index
    %c0_8 = arith.constant 0 : index
    %9 = vector.load %arg5[%c0_7, %c0_8] : memref<16x128xf32, #tpu.memory_space<vmem>>, vector<16x128xf32>
    %cst_9 = arith.constant dense<0.000000e+00> : vector<8x128xf32>
    %10 = tpu.matmul %8, %9, %cst_9 {dimension_numbers = #tpu.dot_dimension_numbers<[1], [0], [0], [1], [0, 0, 1, 1], [], []>} : vector<8x16xf32>, vector<16x128xf32>, vector<8x128xf32> -> vector<8x128xf32>
    %11 = arith.mulf %2, %10 : vector<8x128xf32>
    %c0_10 = arith.constant 0 : index
    %c0_11 = arith.constant 0 : index
    %12 = vector.load %arg3[%c0_10, %c0_11] : memref<1x128xf32, #tpu.memory_space<vmem>>, vector<1x128xf32>
    %13 = vector.broadcast %12 : vector<1x128xf32> to vector<8x128xf32>
    %14 = arith.addf %11, %13 : vector<8x128xf32>
    %c0_12 = arith.constant 0 : index
    %c0_13 = arith.constant 0 : index
    %15 = vector.load %arg6[%c0_12, %c0_13] : memref<8x128xf32, #tpu.memory_space<vmem>>, vector<8x128xf32>
    tpu.vector_store %arg6[%c0_12, %c0_13], %14 {strides = array<i32>} : memref<8x128xf32, #tpu.memory_space<vmem>>, vector<8x128xf32>,
    return
  }
  func.func @transform_0(%arg0: i32) -> (i32, i32) {
    %c0_i32 = arith.constant 0 : i32
    %c0_i32_0 = arith.constant 0 : i32
    return %arg0, %c0_i32 : i32, i32
  }
  func.func @transform_1(%arg0: i32) -> (i32, i32) {
    %c0_i32 = arith.constant 0 : i32
    %c0_i32_0 = arith.constant 0 : i32
    %c0_i32_1 = arith.constant 0 : i32
    return %c0_i32, %c0_i32_0 : i32, i32
  }
  func.func @transform_2(%arg0: i32) -> (i32, i32) {
    %c0_i32 = arith.constant 0 : i32
    %c0_i32_0 = arith.constant 0 : i32
    %c0_i32_1 = arith.constant 0 : i32
    return %c0_i32, %c0_i32_0 : i32, i32
  }
  func.func @transform_3(%arg0: i32) -> (i32, i32) {
    %c0_i32 = arith.constant 0 : i32
    %c0_i32_0 = arith.constant 0 : i32
    %c0_i32_1 = arith.constant 0 : i32
    return %c0_i32, %c0_i32_0 : i32, i32
  }
  func.func @transform_4(%arg0: i32) -> (i32, i32) {
    %c0_i32 = arith.constant 0 : i32
    %c0_i32_0 = arith.constant 0 : i32
    %c0_i32_1 = arith.constant 0 : i32
    return %c0_i32, %c0_i32_0 : i32, i32
  }
  func.func @transform_5(%arg0: i32) -> (i32, i32) {
    %c0_i32 = arith.constant 0 : i32
    %c0_i32_0 = arith.constant 0 : i32
    return %arg0, %c0_i32 : i32, i32
  }
}

</mosaic_0001>

<bundles_post_ra>
// kernel: tpu_custom_call.1
= control target key start
LH: loop header
LB: loop body
LE: loop exit
PB: predicated region body
PF: predicated region fallthrough
CT: control target
= control target key end

     0   :  { %10 = vsyncpa [#allocation3], 0  ;;  %s661_s0 = inlined_call_operand.hbm [shape: f32[8,128], index: 0, kind: input, shape index: {}]   ;;  %s662_s1 = inlined_call_operand.vmem [shape: f32[128,128], index: 1, kind: input, shape index: {}]   ;;  %s663_s2 = inlined_call_operand.vmem [shape: f32[1,128], index: 2, kind: input, shape index: {}]   ;;  %s664_s3 = inlined_call_operand.vmem [shape: f32[128,16], index: 3, kind: input, shape index: {}]   ;;  %s665_s4 = inlined_call_operand.vmem [shape: f32[16,128], index: 4, kind: input, shape index: {}]   ;;  %s666_s5 = inlined_call_operand.hbm [shape: f32[8,128], index: 5, kind: output, shape index: {}]  }
   0x1   :  { %11 = vsyncpa [#allocation4], 0  ;;  %s476_s18 = smov [#allocation2]  }
   0x2   :  { %s18_s19 = sshll.u32 %s476_s18, 4  ;;  %s19_s19 = int_to_ptr.vmem [resolvable:$true] %s18_s19 }
   0x3   :  { %s440_s20 = scalar_lea.vmem %s19_s19, 128  ;;  %p445_p1 = scmp.lt.s32.totalorder %s19_s19, %s19_s19 }
   0x4   :  { %p441_p0 = scmp.ne.s32.totalorder %s19_s19, %s440_s20  ;;  %p446_p2 = scmp.lt.s32.totalorder %s440_s20, %s440_s20 }
   0x6   :  { %p447_p3 = por %p446_p2, %p445_p1 }
   0x8   :  { %p448_p4 = pnand %p447_p3, %p441_p0 }
   0xa   :  { %451 = shalt.err (!%p448_p4)
}
   0xb   :  { %21 = dma.hbm_to_vmem [thread:$0]  %s661_s0, 128, %s19_s19, [#allocation3]  }
   0xc   :  { %472 = dma.done.wait [#allocation3], 128  }
   0xd   :  { %473 = vsyncadd [#allocation3], 4294967168  ;;  %v477_v0 = vmov 0.0   ;;  %vm478_vm0 = vmmov 0   ;;  %v136_v1 = vld [vmem:[%s664_s3 + $0x78] sm:$0xff]  ;;  %v135_v2 = vld [vmem:[%s664_s3 + $0x70] sm:$0xff] }
   0xe   :  { %384 = vmatprep.subr.mxu1 %v477_v0  ;;  %416 = vmatprep.mubr.msk.f32.mxu1 %vm478_vm0, %v477_v0  ;;  %v134_v3 = vld [vmem:[%s664_s3 + $0x68] sm:$0xff]  ;;  %v133_v4 = vld [vmem:[%s664_s3 + $0x60] sm:$0xff]  ;;  %v49_v5 = vld [vmem:[%s662_s1 + $0x78] sm:$0xff]  ;;  %vm211_vm1 = vcmask 130048  }
   0xf   :  { %349 = vmatprep.subr.mxu0 %v477_v0  ;;  %381 = vmatprep.mubr.msk.f32.mxu0 %vm478_vm0, %v477_v0  ;;  %v132_v6 = vld [vmem:[%s664_s3 + $0x58] sm:$0xff]  ;;  %v48_v7 = vld [vmem:[%s662_s1 + $0x70] sm:$0xff]  ;;  %v47_v8 = vld [vmem:[%s662_s1 + $0x68] sm:$0xff] }
  0x10   :  { %385 = vmatpush3.msra.mxu1 %v136_v1  ;;  %350 = vmatpush3.msra.mxu0 %v49_v5  ;;  %v131_v9 = vld [vmem:[%s664_s3 + $0x50] sm:$0xff]  ;;  %v46_v10 = vld [vmem:[%s662_s1 + $0x60] sm:$0xff]  ;;  %v130_v11 = vld [vmem:[%s664_s3 + $0x48] sm:$0xff] }
  0x11   :  { %386 = vmatprep.subr.mxu1 %v477_v0  ;;  %351 = vmatprep.subr.mxu0 %v477_v0  ;;  %v45_v12 = vld [vmem:[%s662_s1 + $0x58] sm:$0xff]  ;;  %v129_v13 = vld [vmem:[%s664_s3 + $0x40] sm:$0xff]  ;;  %v44_v14 = vld [vmem:[%s662_s1 + $0x50] sm:$0xff] }
  0x12   :  { %387 = vmatpush3.msra.mxu1 %v135_v2  ;;  %352 = vmatpush3.msra.mxu0 %v48_v7  ;;  %v128_v15 = vld [vmem:[%s664_s3 + $0x38] sm:$0xff]  ;;  %v43_v16 = vld [vmem:[%s662_s1 + $0x48] sm:$0xff]  ;;  %v127_v17 = vld [vmem:[%s664_s3 + $0x30] sm:$0xff] }
  0x13   :  { %388 = vmatprep.subr.mxu1 %v477_v0  ;;  %353 = vmatprep.subr.mxu0 %v477_v0  ;;  %v42_v18 = vld [vmem:[%s662_s1 + $0x40] sm:$0xff]  ;;  %v126_v19 = vld [vmem:[%s664_s3 + $0x28] sm:$0xff]  ;;  %v41_v20 = vld [vmem:[%s662_s1 + $0x38] sm:$0xff] }
  0x14   :  { %389 = vmatpush3.msra.mxu1 %v134_v3  ;;  %354 = vmatpush3.msra.mxu0 %v47_v8  ;;  %v125_v21 = vld [vmem:[%s664_s3 + $0x20] sm:$0xff]  ;;  %v40_v22 = vld [vmem:[%s662_s1 + $0x30] sm:$0xff]  ;;  %v124_v23 = vld [vmem:[%s664_s3 + $0x18] sm:$0xff] }
  0x15   :  { %390 = vmatprep.subr.mxu1 %v477_v0  ;;  %355 = vmatprep.subr.mxu0 %v477_v0  ;;  %v39_v24 = vld [vmem:[%s662_s1 + $0x28] sm:$0xff]  ;;  %v123_v25 = vld [vmem:[%s664_s3 + $0x10] sm:$0xff]  ;;  %v33_v26 = vld [vmem:[#allocation2] sm:$0xff] }
  0x16   :  { %391 = vmatpush3.msra.mxu1 %v133_v4  ;;  %356 = vmatpush3.msra.mxu0 %v46_v10  ;;  %v122_v27 = vld [vmem:[%s664_s3 + $0x8] sm:$0xff]  ;;  %v121_v28 = vld [vmem:[%s664_s3] sm:$0xff]  ;;  %v120_v29 = vmul.f32 %v33_v26, %v33_v26  ;;  %v37_v31 = vld [vmem:[%s662_s1 + $0x18] sm:$0xff] }
  0x17   :  { %392 = vmatprep.subr.mxu1 %v477_v0  ;;  %357 = vmatprep.subr.mxu0 %v477_v0  ;;  %v38_v30 = vld [vmem:[%s662_s1 + $0x20] sm:$0xff]  ;;  %v36_v32 = vld [vmem:[%s662_s1 + $0x10] sm:$0xff]  ;;  %v35_v33 = vld [vmem:[%s662_s1 + $0x8] sm:$0xff] }
  0x18   :  { %393 = vmatpush3.msra.mxu1 %v132_v6  ;;  %358 = vmatpush3.msra.mxu0 %v45_v12  ;;  %v34_v34 = vld [vmem:[%s662_s1] sm:$0xff]  ;;  %v210_v35 = vld [vmem:[%s665_s4 + $0x8] sm:$0xff] }
  0x19   :  { %394 = vmatprep.subr.mxu1 %v477_v0  ;;  %359 = vmatprep.subr.mxu0 %v477_v0  ;;  %v209_v36 = vld [vmem:[%s665_s4] sm:$0xff]  ;;  %s479_s4 = smov [#allocation5]  }
  0x1a   :  { %395 = vmatpush3.msra.mxu1 %v131_v9  ;;  %360 = vmatpush3.msra.mxu0 %v44_v14  ;;  %v311_v44 = vld [vmem:[%s663_s2] ss:$0 sm:$0xff]  ;;  %s301_s13 = sshll.u32 %s479_s4, 4  ;;  %s302_s13 = int_to_ptr.vmem [resolvable:$true] %s301_s13 }
  0x1b   :  { %396 = vmatprep.subr.mxu1 %v477_v0  ;;  %361 = vmatprep.subr.mxu0 %v477_v0  ;;  %s452_s14 = scalar_lea.vmem %s302_s13, 128  ;;  %p457_p6 = scmp.lt.s32.totalorder %s302_s13, %s302_s13 }
  0x1c   :  { %397 = vmatpush3.msra.mxu1 %v130_v11  ;;  %362 = vmatpush3.msra.mxu0 %v43_v16  ;;  %p453_p5 = scmp.ne.s32.totalorder %s302_s13, %s452_s14  ;;  %p458_p7 = scmp.lt.s32.totalorder %s452_s14, %s452_s14 }
  0x1d   :  { %398 = vmatprep.subr.mxu1 %v477_v0  ;;  %363 = vmatprep.subr.mxu0 %v477_v0 }
  0x1e   :  { %399 = vmatpush3.msra.mxu1 %v129_v13  ;;  %364 = vmatpush3.msra.mxu0 %v42_v18  ;;  %p459_p8 = por %p458_p7, %p457_p6 }
  0x1f   :  { %400 = vmatprep.subr.mxu1 %v477_v0  ;;  %365 = vmatprep.subr.mxu0 %v477_v0 }
  0x20   :  { %401 = vmatpush3.msra.mxu1 %v128_v15  ;;  %366 = vmatpush3.msra.mxu0 %v41_v20  ;;  %p460_p9 = pnand %p459_p8, %p453_p5 }
  0x21   :  { %402 = vmatprep.subr.mxu1 %v477_v0  ;;  %367 = vmatprep.subr.mxu0 %v477_v0 }
  0x22   :  { %403 = vmatpush3.msra.mxu1 %v127_v17  ;;  %368 = vmatpush3.msra.mxu0 %v40_v22 }
  0x23   :  { %404 = vmatprep.subr.mxu1 %v477_v0  ;;  %369 = vmatprep.subr.mxu0 %v477_v0 }
  0x24   :  { %405 = vmatpush3.msra.mxu1 %v126_v19  ;;  %370 = vmatpush3.msra.mxu0 %v39_v24 }
  0x25   :  { %406 = vmatprep.subr.mxu1 %v477_v0  ;;  %371 = vmatprep.subr.mxu0 %v477_v0 }
  0x26   :  { %407 = vmatpush3.msra.mxu1 %v125_v21  ;;  %372 = vmatpush3.msra.mxu0 %v38_v30 }
  0x27   :  { %408 = vmatprep.subr.mxu1 %v477_v0  ;;  %373 = vmatprep.subr.mxu0 %v477_v0 }
  0x28   :  { %409 = vmatpush3.msra.mxu1 %v124_v23  ;;  %374 = vmatpush3.msra.mxu0 %v37_v31 }
  0x29   :  { %410 = vmatprep.subr.mxu1 %v477_v0  ;;  %375 = vmatprep.subr.mxu0 %v477_v0 }
  0x2a   :  { %411 = vmatpush3.msra.mxu1 %v123_v25  ;;  %376 = vmatpush3.msra.mxu0 %v36_v32 }
  0x2b   :  { %412 = vmatprep.subr.mxu1 %v477_v0  ;;  %377 = vmatprep.subr.mxu0 %v477_v0 }
  0x2c   :  { %413 = vmatpush3.msra.mxu1 %v122_v27  ;;  %378 = vmatpush3.msra.mxu0 %v35_v33 }
  0x2d   :  { %414 = vmatprep.subr.mxu1 %v477_v0  ;;  %379 = vmatprep.subr.mxu0 %v477_v0 }
  0x2e   :  { %415 = vmatpush3.msra.mxu1 %v121_v28  ;;  %380 = vmatpush3.msra.mxu0 %v34_v34 }
  0x2f   :  { %417 = vmatmul.mubr.f32.vlgmr.msra.gmra.mxu1 %v120_v29  ;;  %382 = vmatmul.mubr.f32.vlgmr.msra.gmra.mxu0 %v33_v26 }
  0x30   :  { %419 = vmatprep.subr.mxu0 %v477_v0  ;;  %423 = vmatprep.mubr.msk.f32.mxu0 %vm478_vm0, %v477_v0 }
  0x31   :  { %420 = vmatpush3.msra.mxu0 %v210_v35 }
  0x32   :  { %421 = vmatprep.subr.mxu0 %v477_v0 }
  0x33   :  { %422 = vmatpush3.msra.mxu0 %v209_v36 }
  0xef   :  { %v203_v37 = vpop.f32.mrf.mxu1  ;;  %v116_v41 = vpop.f32.mrf.mxu0 }
  0xf0   :  { %v207_v38 = vmax.f32 %v203_v37, 1e-24 }
  0xf1   :  { %v418_v39 = vpop.f32.mrf.mxu1  ;;  %v383_v42 = vpop.f32.mrf.mxu0 }
  0xf2   :  { %430 = vrsqrt.f32 %v207_v38 }
  0xff   :  { %v431_v40 = vpop.eup %430 }
 0x100   :  { %424 = vmatmul.mubr.msk.f32.vlgmr.msra.gmra.mxu0 %vm211_vm1, %v431_v40 }
 0x1c0   :  { %v281_v43 = vpop.f32.mrf.mxu0 }
 0x1c1   :  { %v285_v45 = vmul.f32 %v281_v43, %v116_v41 }
 0x1c2   :  { %v425_v46 = vpop.f32.mrf.mxu0 }
 0x1c3   :  { %v293_v47 = vadd.f32 %v311_v44, %v285_v45 }
 0x1c5   :  { %294 = vst [vmem:[#allocation5] sm:$0xff] %v293_v47 }
 0x1c6   :  { %463 = shalt.err (!%p460_p9)
}
 0x1c7   :  { %304 = dma.vmem_to_hbm [thread:$0]  %s302_s13, 128, %s666_s5, [#allocation4]  }
 0x1c8   :  { %474 = dma.done.wait [#allocation4], 128  }
 0x1c9   :  { %475 = vsyncadd [#allocation4], 4294967168 }
 0x1ca   :  { %308 = vsyncpa [#allocation3], 1 }
 0x1cb   :  { %309 = vsyncpa [#allocation4], 1 }

</bundles_post_ra>
